<compile_context>
chip_gen: v7x
topology: tpu7x:2x2x1
jax: 0.10.0
libtpu: 0.0.40
codegen_flags: <defaults>
</compile_context>

<pallas_src>
import jax
import jax.numpy as jnp
from jax.experimental import pallas as pl
from jax.experimental.pallas import tpu as pltpu

# ----------------------- model hyper-parameters (small) ----------------------
YOLO_WIDTH = 0.125          # -> Cin = int(1024 * 0.125) = 128
HEAD_WIDTH = 0.125          # -> C1  = int(256  * 0.125) = 32, C2 = 64
FPN_CHANNELS = [256, 512, 1024]
OUT_CHANNEL = 16
BN_EPS = 1e-5

CIN = int(FPN_CHANNELS[-1] * YOLO_WIDTH)   # 128
C1 = int(256 * HEAD_WIDTH)                 # 32
C2 = 2 * C1                                # 64

N, H, W = 2, 8, 8                          # per-level M = N*H*W = 128


# --------------------------------- kernel -----------------------------------
def _make_kernel(n, hw, c1, out_ch):
    """Build the per-grid-step kernel for static (batch, H*W, C1, OUT) sizes."""
    inv_m = 1.0 / float(n * hw)
    inv_hw = 1.0 / float(hw)

    def kernel(x_ref, w1t_ref, pp_ref, o_ref):
        # x_ref:   (N, Cin, HW)     f32  -- one level's activations (NCHW view)
        # w1t_ref: (C1, Cin)        bf16 -- conv1 weight transposed
        # pp_ref:  (C1+1, OUT+2)    f32  -- packed params:
        #            [0:C1, 0:OUT]   = w2 @ w3
        #            [C1,   0:OUT]   = b2 @ w3 + b3
        #            [0:C1, OUT]     = gamma      (BN weight)
        #            [0:C1, OUT+1]   = beta       (BN bias)
        # o_ref:   (N, OUT)         f32
        w1t = w1t_ref[...]                                   # (C1, Cin) bf16
        w23 = pp_ref[0:c1, 0:out_ch]                         # (C1, OUT)
        b23 = pp_ref[c1:c1 + 1, 0:out_ch]                    # (1, OUT)
        gamma = pp_ref[0:c1, out_ch:out_ch + 1]              # (C1, 1)
        beta = pp_ref[0:c1, out_ch + 1:out_ch + 2]           # (C1, 1)

        # conv1 (1x1) == matmul, done per sample directly on the NCHW slab so
        # no wrapper-side transpose is needed.  bf16 MXU inputs, f32 accumulate.
        # Conv bias b1 is omitted: train-mode BN subtracts the batch mean, so a
        # per-channel constant bias cancels exactly.
        ys = []
        s = jnp.zeros((c1, 1), jnp.float32)
        ss = jnp.zeros((c1, 1), jnp.float32)
        for i in range(n):
            xi = x_ref[i].astype(jnp.bfloat16)               # (Cin, HW)
            yi = jnp.dot(w1t, xi,
                         preferred_element_type=jnp.float32)  # (C1, HW) f32
            ys.append(yi)
            s = s + jnp.sum(yi, axis=1, keepdims=True)
            ss = ss + jnp.sum(yi * yi, axis=1, keepdims=True)

        # BatchNorm2d (training mode, biased variance), one-pass statistics
        # over the whole batch of this level.
        mean = s * inv_m
        var = jnp.maximum(ss * inv_m - mean * mean, 0.0)
        scale = gamma * jax.lax.rsqrt(var + BN_EPS)          # gamma folded in
        shift = beta - mean * scale

        # BN affine + ReLU + AdaptiveAvgPool2d(1) + folded conv2/conv3 + Tanh.
        rows = []
        for i in range(n):
            ybi = jnp.maximum(ys[i] * scale + shift, 0.0)    # (C1, HW)
            pi = jnp.sum(ybi, axis=1, keepdims=True) * inv_hw  # (C1, 1) pooled
            rows.append(jnp.sum(w23 * pi, axis=0, keepdims=True) + b23)  # (1,OUT)

        # Assemble both sample rows into one (N, OUT) value and write it with a
        # single store (no per-row masked partial stores).
        row_ids = jax.lax.broadcasted_iota(jnp.int32, (n, out_ch), 0)
        o = jnp.zeros((n, out_ch), jnp.float32)
        for i in range(n):
            o = jnp.where(row_ids == i, rows[i], o)
        o_ref[...] = jnp.tanh(o)                             # Flatten(1) is a no-op

    return kernel


# -------------------------------- wrappers ------------------------------------
def yolox_head_forward_levels(x_levels, kparams):
    """Batched forward: x_levels (L, N, Cin, H, W) -> (L, N, OUT).

    One pallas_call with grid=(L,) and 'parallel' semantics; each grid step is
    one full (independent) head invocation with its own BN batch statistics.
    """
    lvls, n, cin, h, w = x_levels.shape
    hw = h * w
    c1 = kparams["w1t"].shape[0]
    out_ch = kparams["pp"].shape[1] - 2

    # Free reshape of the NCHW slab (no transpose, no HBM round trip).
    x_r = x_levels.reshape(lvls, n, cin, hw)

    return pl.pallas_call(
        _make_kernel(n, hw, c1, out_ch),
        out_shape=jax.ShapeDtypeStruct((lvls, n, out_ch), jnp.float32),
        grid=(lvls,),
        in_specs=[
            # Per-level activation block; index_map over the grid axis lets
            # Pallas double-buffer the level l+1 DMA behind level l's compute.
            pl.BlockSpec((None, n, cin, hw), lambda l: (l, 0, 0, 0)),
            # Parameters: constant block index -> fetched once, not re-DMA'd.
            pl.BlockSpec((c1, cin), lambda l: (0, 0)),
            pl.BlockSpec((c1 + 1, out_ch + 2), lambda l: (0, 0)),
        ],
        out_specs=pl.BlockSpec((None, n, out_ch), lambda l: (l, 0, 0)),
        compiler_params=pltpu.CompilerParams(
            dimension_semantics=("parallel",)),   # both v7x TCs take levels
    )(x_r, kparams["w1t"], kparams["pp"])


def yolox_head_forward(x_nchw, kparams):
    """Single-invocation forward matching the PyTorch module: (N,Cin,H,W)->(N,OUT)."""
    return yolox_head_forward_levels(x_nchw[None], kparams)[0]


# ----------------- one-time parameter folding / packing ----------------------
def pack_kernel_params(params):
    """Fold conv2+conv3, drop b1, pack everything into two buffers (done once)."""
    w23 = params["w2"] @ params["w3"]                        # (C1, OUT)
    b23 = params["b2"] @ params["w3"] + params["b3"]         # (1, OUT)
    c1, out_ch = w23.shape
    pp = jnp.zeros((c1 + 1, out_ch + 2), jnp.float32)
    pp = pp.at[:c1, :out_ch].set(w23)
    pp = pp.at[c1, :out_ch].set(b23[0])
    pp = pp.at[:c1, out_ch].set(params["gamma"].reshape(-1))
    pp = pp.at[:c1, out_ch + 1].set(params["beta"].reshape(-1))
    return {
        "w1t": params["w1"].T.astype(jnp.bfloat16),          # (C1, Cin) bf16
        "pp": pp.astype(jnp.float32),                        # (C1+1, OUT+2) f32
    }


# --------------------------- pure-JAX reference -------------------------------
def yolox_head_reference(x_nchw, params):
    n, cin, h, w = x_nchw.shape
    x = jnp.transpose(x_nchw, (0, 2, 3, 1)).reshape(n * h * w, cin)
    y1 = x @ params["w1"] + params["b1"]
    mean = jnp.mean(y1, axis=0, keepdims=True)
    var = jnp.mean((y1 - mean) ** 2, axis=0, keepdims=True)
    y1 = (y1 - mean) * jax.lax.rsqrt(var + BN_EPS) * params["gamma"] + params["beta"]
    y1 = jnp.maximum(y1, 0.0)
    p = jnp.mean(y1.reshape(n, h * w, -1), axis=1)
    y2 = p @ params["w2"] + params["b2"]
    y3 = y2 @ params["w3"] + params["b3"]
    return jnp.tanh(y3)


# ---------------------------- deterministic init ------------------------------
def init_params(key):
    ks = jax.random.split(key, 6)
    scale = 0.05
    # PyTorch Conv2d(out, in, 1, 1) weights stored transposed as (in, out).
    return {
        "w1": scale * jax.random.normal(ks[0], (CIN, C1), jnp.float32),
        "b1": scale * jax.random.normal(ks[1], (1, C1), jnp.float32),
        "gamma": jnp.ones((1, C1), jnp.float32),
        "beta": jnp.zeros((1, C1), jnp.float32),
        "w2": scale * jax.random.normal(ks[2], (C1, C2), jnp.float32),
        "b2": scale * jax.random.normal(ks[3], (1, C2), jnp.float32),
        "w3": scale * jax.random.normal(ks[4], (C2, OUT_CHANNEL), jnp.float32),
        "b3": scale * jax.random.normal(ks[5], (1, OUT_CHANNEL), jnp.float32),
    }


if __name__ == "__main__":
    key = jax.random.PRNGKey(0)
    kx, kx2, kp = jax.random.split(key, 3)
    params = init_params(kp)
    kparams = pack_kernel_params(params)                     # folded once, offline

    # (1) Single-invocation forward, exactly the PyTorch module's signature.
    x = jax.random.normal(kx, (N, CIN, H, W), jnp.float32)   # NCHW, like PyTorch
    fwd = jax.jit(yolox_head_forward)
    y = jax.block_until_ready(fwd(x, kparams))
    y_ref = yolox_head_reference(x, params)
    assert y.shape == (N, OUT_CHANNEL), y.shape
    # conv1 runs with bf16 MXU inputs (f32 accumulate); compare against the
    # pure-f32 reference with a slightly relaxed tolerance.
    err = float(jnp.max(jnp.abs(y - y_ref)))
    assert jnp.allclose(y, y_ref, atol=3e-3, rtol=3e-3), err

    # (2) Several independent head invocations batched behind one pallas_call
    #     (leading 'parallel' grid axis) -- the main structural perf change.
    L = 4
    x_lvls = jax.random.normal(kx2, (L, N, CIN, H, W), jnp.float32)
    fwd_lvls = jax.jit(yolox_head_forward_levels)
    y_lvls = jax.block_until_ready(fwd_lvls(x_lvls, kparams))
    assert y_lvls.shape == (L, N, OUT_CHANNEL), y_lvls.shape
    for lvl in range(L):
        y_ref_l = yolox_head_reference(x_lvls[lvl], params)
        err_l = float(jnp.max(jnp.abs(y_lvls[lvl] - y_ref_l)))
        assert jnp.allclose(y_lvls[lvl], y_ref_l, atol=3e-3, rtol=3e-3), (lvl, err_l)

    print("KERNEL_OK")
</pallas_src>

<mosaic_0001>
module attributes {stable_mosaic.version = 11 : i64} {
  func.func @kernel(%arg0: i32, %arg1: memref<1x2x128x64xf32, #tpu.memory_space<vmem>>, %arg2: memref<32x128xbf16, #tpu.memory_space<vmem>>, %arg3: memref<33x18xf32, #tpu.memory_space<vmem>>, %arg4: memref<1x2x16xf32, #tpu.memory_space<vmem>>) attributes {dimension_semantics = [#tpu.dimension_semantics<parallel>], iteration_bounds = array<i64: 1>, scalar_prefetch = 0 : i64, scratch_operands = 0 : i64, tpu.core_type = #tpu.core_type<tc>, window_params = [{transform_indices = @transform_0, window_bounds = array<i64: 1, 2, 128, 64>}, {pipeline_mode = #tpu.pipeline_mode<synchronous>, transform_indices = @transform_1, window_bounds = array<i64: 32, 128>}, {pipeline_mode = #tpu.pipeline_mode<synchronous>, transform_indices = @transform_2, window_bounds = array<i64: 33, 18>}, {transform_indices = @transform_3, window_bounds = array<i64: 1, 2, 16>}]} {
    %c0 = arith.constant 0 : index
    %c0_0 = arith.constant 0 : index
    %0 = vector.load %arg2[%c0, %c0_0] : memref<32x128xbf16, #tpu.memory_space<vmem>>, vector<32x128xbf16>
    %c0_1 = arith.constant 0 : index
    %c0_2 = arith.constant 0 : index
    %1 = vector.load %arg3[%c0_1, %c0_2] : memref<33x18xf32, #tpu.memory_space<vmem>>, vector<32x16xf32>
    %c32 = arith.constant 32 : index
    %c0_3 = arith.constant 0 : index
    %2 = vector.load %arg3[%c32, %c0_3] : memref<33x18xf32, #tpu.memory_space<vmem>>, vector<1x16xf32>
    %c0_4 = arith.constant 0 : index
    %c16 = arith.constant 16 : index
    %3 = vector.load %arg3[%c0_4, %c16] : memref<33x18xf32, #tpu.memory_space<vmem>>, vector<32x1xf32>
    %c0_5 = arith.constant 0 : index
    %c17 = arith.constant 17 : index
    %4 = vector.load %arg3[%c0_5, %c17] : memref<33x18xf32, #tpu.memory_space<vmem>>, vector<32x1xf32>
    %cst = arith.constant 0.000000e+00 : f32
    %5 = vector.broadcast %cst : f32 to vector<32x1xf32>
    %cst_6 = arith.constant 0.000000e+00 : f32
    %6 = vector.broadcast %cst_6 : f32 to vector<32x1xf32>
    %c0_7 = arith.constant 0 : index
    %c0_8 = arith.constant 0 : index
    %c0_9 = arith.constant 0 : index
    %c0_10 = arith.constant 0 : index
    %7 = vector.load %arg1[%c0_7, %c0_8, %c0_9, %c0_10] : memref<1x2x128x64xf32, #tpu.memory_space<vmem>>, vector<1x1x128x64xf32>
    %8 = vector.shape_cast %7 : vector<1x1x128x64xf32> to vector<128x64xf32>
    %9 = arith.truncf %8 : vector<128x64xf32> to vector<128x64xbf16>
    %cst_11 = arith.constant dense<0.000000e+00> : vector<32x64xf32>
    %10 = tpu.matmul %0, %9, %cst_11 {dimension_numbers = #tpu.dot_dimension_numbers<[1], [0], [0], [1], [0, 0, 1, 1], [], []>} : vector<32x128xbf16>, vector<128x64xbf16>, vector<32x64xf32> -> vector<32x64xf32>
    %cst_12 = arith.constant dense<0.000000e+00> : vector<32xf32>
    %11 = vector.multi_reduction <add>, %10, %cst_12 [1] : vector<32x64xf32> to vector<32xf32>
    %12 = vector.shape_cast %11 : vector<32xf32> to vector<32x1xf32>
    %13 = arith.addf %5, %12 : vector<32x1xf32>
    %14 = arith.mulf %10, %10 : vector<32x64xf32>
    %cst_13 = arith.constant dense<0.000000e+00> : vector<32xf32>
    %15 = vector.multi_reduction <add>, %14, %cst_13 [1] : vector<32x64xf32> to vector<32xf32>
    %16 = vector.shape_cast %15 : vector<32xf32> to vector<32x1xf32>
    %17 = arith.addf %6, %16 : vector<32x1xf32>
    %c0_14 = arith.constant 0 : index
    %c1 = arith.constant 1 : index
    %c0_15 = arith.constant 0 : index
    %c0_16 = arith.constant 0 : index
    %18 = vector.load %arg1[%c0_14, %c1, %c0_15, %c0_16] : memref<1x2x128x64xf32, #tpu.memory_space<vmem>>, vector<1x1x128x64xf32>
    %19 = vector.shape_cast %18 : vector<1x1x128x64xf32> to vector<128x64xf32>
    %20 = arith.truncf %19 : vector<128x64xf32> to vector<128x64xbf16>
    %cst_17 = arith.constant dense<0.000000e+00> : vector<32x64xf32>
    %21 = tpu.matmul %0, %20, %cst_17 {dimension_numbers = #tpu.dot_dimension_numbers<[1], [0], [0], [1], [0, 0, 1, 1], [], []>} : vector<32x128xbf16>, vector<128x64xbf16>, vector<32x64xf32> -> vector<32x64xf32>
    %cst_18 = arith.constant dense<0.000000e+00> : vector<32xf32>
    %22 = vector.multi_reduction <add>, %21, %cst_18 [1] : vector<32x64xf32> to vector<32xf32>
    %23 = vector.shape_cast %22 : vector<32xf32> to vector<32x1xf32>
    %24 = arith.addf %13, %23 : vector<32x1xf32>
    %25 = arith.mulf %21, %21 : vector<32x64xf32>
    %cst_19 = arith.constant dense<0.000000e+00> : vector<32xf32>
    %26 = vector.multi_reduction <add>, %25, %cst_19 [1] : vector<32x64xf32> to vector<32xf32>
    %27 = vector.shape_cast %26 : vector<32xf32> to vector<32x1xf32>
    %28 = arith.addf %17, %27 : vector<32x1xf32>
    %cst_20 = arith.constant 7.812500e-03 : f32
    %29 = vector.broadcast %cst_20 : f32 to vector<32x1xf32>
    %30 = arith.mulf %24, %29 : vector<32x1xf32>
    %cst_21 = arith.constant 7.812500e-03 : f32
    %31 = vector.broadcast %cst_21 : f32 to vector<32x1xf32>
    %32 = arith.mulf %28, %31 : vector<32x1xf32>
    %33 = arith.mulf %30, %30 : vector<32x1xf32>
    %34 = arith.subf %32, %33 : vector<32x1xf32>
    %cst_22 = arith.constant 0.000000e+00 : f32
    %35 = vector.broadcast %cst_22 : f32 to vector<32x1xf32>
    %36 = arith.maximumf %34, %35 : vector<32x1xf32>
    %cst_23 = arith.constant 9.99999974E-6 : f32
    %37 = vector.broadcast %cst_23 : f32 to vector<32x1xf32>
    %38 = arith.addf %36, %37 : vector<32x1xf32>
    %39 = math.rsqrt %38 : vector<32x1xf32>
    %40 = arith.mulf %3, %39 : vector<32x1xf32>
    %41 = arith.mulf %30, %40 : vector<32x1xf32>
    %42 = arith.subf %4, %41 : vector<32x1xf32>
    %43 = vector.broadcast %40 : vector<32x1xf32> to vector<32x64xf32>
    %44 = arith.mulf %10, %43 : vector<32x64xf32>
    %45 = vector.broadcast %42 : vector<32x1xf32> to vector<32x64xf32>
    %46 = arith.addf %44, %45 : vector<32x64xf32>
    %cst_24 = arith.constant 0.000000e+00 : f32
    %47 = vector.broadcast %cst_24 : f32 to vector<32x64xf32>
    %48 = arith.maximumf %46, %47 : vector<32x64xf32>
    %cst_25 = arith.constant dense<0.000000e+00> : vector<32xf32>
    %49 = vector.multi_reduction <add>, %48, %cst_25 [1] : vector<32x64xf32> to vector<32xf32>
    %50 = vector.shape_cast %49 : vector<32xf32> to vector<32x1xf32>
    %cst_26 = arith.constant 1.562500e-02 : f32
    %51 = vector.broadcast %cst_26 : f32 to vector<32x1xf32>
    %52 = arith.mulf %50, %51 : vector<32x1xf32>
    %53 = vector.broadcast %52 : vector<32x1xf32> to vector<32x16xf32>
    %54 = arith.mulf %1, %53 : vector<32x16xf32>
    %cst_27 = arith.constant dense<0.000000e+00> : vector<16xf32>
    %55 = vector.multi_reduction <add>, %54, %cst_27 [0] : vector<32x16xf32> to vector<16xf32>
    %56 = vector.shape_cast %55 : vector<16xf32> to vector<1x16xf32>
    %57 = arith.addf %56, %2 : vector<1x16xf32>
    %58 = vector.broadcast %40 : vector<32x1xf32> to vector<32x64xf32>
    %59 = arith.mulf %21, %58 : vector<32x64xf32>
    %60 = vector.broadcast %42 : vector<32x1xf32> to vector<32x64xf32>
    %61 = arith.addf %59, %60 : vector<32x64xf32>
    %cst_28 = arith.constant 0.000000e+00 : f32
    %62 = vector.broadcast %cst_28 : f32 to vector<32x64xf32>
    %63 = arith.maximumf %61, %62 : vector<32x64xf32>
    %cst_29 = arith.constant dense<0.000000e+00> : vector<32xf32>
    %64 = vector.multi_reduction <add>, %63, %cst_29 [1] : vector<32x64xf32> to vector<32xf32>
    %65 = vector.shape_cast %64 : vector<32xf32> to vector<32x1xf32>
    %cst_30 = arith.constant 1.562500e-02 : f32
    %66 = vector.broadcast %cst_30 : f32 to vector<32x1xf32>
    %67 = arith.mulf %65, %66 : vector<32x1xf32>
    %68 = vector.broadcast %67 : vector<32x1xf32> to vector<32x16xf32>
    %69 = arith.mulf %1, %68 : vector<32x16xf32>
    %cst_31 = arith.constant dense<0.000000e+00> : vector<16xf32>
    %70 = vector.multi_reduction <add>, %69, %cst_31 [0] : vector<32x16xf32> to vector<16xf32>
    %71 = vector.shape_cast %70 : vector<16xf32> to vector<1x16xf32>
    %72 = arith.addf %71, %2 : vector<1x16xf32>
    %73 = tpu.iota {dimensions = array<i32: 0>} : vector<2x16xi32>
    %cst_32 = arith.constant 0.000000e+00 : f32
    %74 = vector.broadcast %cst_32 : f32 to vector<2x16xf32>
    %c0_i32 = arith.constant 0 : i32
    %75 = vector.broadcast %c0_i32 : i32 to vector<2x16xi32>
    %76 = arith.cmpi eq, %73, %75 : vector<2x16xi32>
    %77 = vector.shape_cast %57 : vector<1x16xf32> to vector<1x16xf32>
    %78 = vector.broadcast %77 : vector<1x16xf32> to vector<2x16xf32>
    %79 = arith.select %76, %78, %74 : vector<2x16xi1>, vector<2x16xf32>
    %c1_i32 = arith.constant 1 : i32
    %80 = vector.broadcast %c1_i32 : i32 to vector<2x16xi32>
    %81 = arith.cmpi eq, %73, %80 : vector<2x16xi32>
    %82 = vector.shape_cast %72 : vector<1x16xf32> to vector<1x16xf32>
    %83 = vector.broadcast %82 : vector<1x16xf32> to vector<2x16xf32>
    %84 = arith.select %81, %83, %79 : vector<2x16xi1>, vector<2x16xf32>
    %85 = math.tanh %84 : vector<2x16xf32>
    %c0_33 = arith.constant 0 : index
    %c0_34 = arith.constant 0 : index
    %c0_35 = arith.constant 0 : index
    %86 = vector.load %arg4[%c0_33, %c0_34, %c0_35] : memref<1x2x16xf32, #tpu.memory_space<vmem>>, vector<1x2x16xf32>
    %87 = vector.shape_cast %86 : vector<1x2x16xf32> to vector<2x16xf32>
    %88 = vector.shape_cast %85 : vector<2x16xf32> to vector<1x2x16xf32>
    tpu.vector_store %arg4[%c0_33, %c0_34, %c0_35], %88 {strides = array<i32>} : memref<1x2x16xf32, #tpu.memory_space<vmem>>, vector<1x2x16xf32>,
    return
  }
  func.func @transform_0(%arg0: i32) -> (i32, i32, i32, i32) {
    %c0_i32 = arith.constant 0 : i32
    %c0_i32_0 = arith.constant 0 : i32
    %c0_i32_1 = arith.constant 0 : i32
    %c0_i32_2 = arith.constant 0 : i32
    return %arg0, %c0_i32, %c0_i32_0, %c0_i32_1 : i32, i32, i32, i32
  }
  func.func @transform_1(%arg0: i32) -> (i32, i32) {
    %c0_i32 = arith.constant 0 : i32
    %c0_i32_0 = arith.constant 0 : i32
    %c0_i32_1 = arith.constant 0 : i32
    return %c0_i32, %c0_i32_0 : i32, i32
  }
  func.func @transform_2(%arg0: i32) -> (i32, i32) {
    %c0_i32 = arith.constant 0 : i32
    %c0_i32_0 = arith.constant 0 : i32
    %c0_i32_1 = arith.constant 0 : i32
    return %c0_i32, %c0_i32_0 : i32, i32
  }
  func.func @transform_3(%arg0: i32) -> (i32, i32, i32) {
    %c0_i32 = arith.constant 0 : i32
    %c0_i32_0 = arith.constant 0 : i32
    %c0_i32_1 = arith.constant 0 : i32
    return %arg0, %c0_i32, %c0_i32_0 : i32, i32, i32
  }
}

</mosaic_0001>

<bundles_post_ra>
// kernel: yolox_head_forward.1
= control target key start
LH: loop header
LB: loop body
LE: loop exit
PB: predicated region body
PF: predicated region fallthrough
CT: control target
= control target key end

     0   :  { %s856_s0 = inlined_call_operand.vmem [shape: f32[1,2,128,64], index: 0, kind: input, shape index: {}]   ;;  %s857_s1 = inlined_call_operand.vmem [shape: bf16[32,128], index: 1, kind: input, shape index: {}]   ;;  %s858_s2 = inlined_call_operand.vmem [shape: f32[33,18], index: 2, kind: input, shape index: {}]   ;;  %s859_s3 = inlined_call_operand.hbm [shape: f32[1,2,16], index: 3, kind: output, shape index: {}]  }
   0x1   :  { %v25_v0 = vld [vmem:[%s856_s0] sm:$0xff]  ;;  %v26_v1 = vld [vmem:[%s856_s0 + $0x8] sm:$0xff]  ;;  %v27_v5 = vld [vmem:[%s856_s0 + $0x10] sm:$0xff] }
   0x2   :  { %v479_v2 = vld [vmem:[%s856_s0 + $0x80] sm:$0xff]  ;;  %v41_v3 = vpack.c.bf16 %v26_v1, %v25_v0  ;;  %v480_v4 = vld [vmem:[%s856_s0 + $0x88] sm:$0xff]  ;;  %v28_v6 = vld [vmem:[%s856_s0 + $0x18] sm:$0xff] }
   0x3   :  { %v164_v7 = vpack.c.bf16 %v480_v4, %v479_v2  ;;  %v42_v8 = vpack.c.bf16 %v28_v6, %v27_v5  ;;  %v481_v9 = vld [vmem:[%s856_s0 + $0x90] sm:$0xff]  ;;  %v482_v10 = vld [vmem:[%s856_s0 + $0x98] sm:$0xff]  ;;  %v29_v11 = vld [vmem:[%s856_s0 + $0x20] sm:$0xff] }
   0x4   :  { %515 = vmatprep.subr.bf16.mxu0 %v41_v3  ;;  %v165_v12 = vpack.c.bf16 %v482_v10, %v481_v9  ;;  %v30_v13 = vld [vmem:[%s856_s0 + $0x28] sm:$0xff]  ;;  %v483_v14 = vld [vmem:[%s856_s0 + $0xa0] sm:$0xff]  ;;  %v31_v18 = vld [vmem:[%s856_s0 + $0x30] sm:$0xff] }
   0x5   :  { %v484_v15 = vld [vmem:[%s856_s0 + $0xa8] sm:$0xff]  ;;  %535 = vmatprep.subr.bf16.mxu1 %v164_v7  ;;  %516 = vmatpush3.bf16.msra.mxu0 %v41_v3  ;;  %v43_v16 = vpack.c.bf16 %v30_v13, %v29_v11  ;;  %v32_v19 = vld [vmem:[%s856_s0 + $0x38] sm:$0xff]  ;;  %v485_v20 = vld [vmem:[%s856_s0 + $0xb0] sm:$0xff] }
   0x6   :  { %536 = vmatpush3.bf16.msra.mxu1 %v164_v7  ;;  %517 = vmatprep.subr.bf16.mxu0 %v42_v8  ;;  %v166_v17 = vpack.c.bf16 %v484_v15, %v483_v14  ;;  %v486_v21 = vld [vmem:[%s856_s0 + $0xb8] sm:$0xff]  ;;  %v44_v22 = vpack.c.bf16 %v32_v19, %v31_v18  ;;  %v33_v23 = vld [vmem:[%s856_s0 + $0x40] sm:$0xff]  ;;  %v34_v24 = vld [vmem:[%s856_s0 + $0x48] sm:$0xff] }
   0x7   :  { %537 = vmatprep.subr.bf16.mxu1 %v165_v12  ;;  %v167_v25 = vpack.c.bf16 %v486_v21, %v485_v20  ;;  %v487_v26 = vld [vmem:[%s856_s0 + $0xc0] sm:$0xff]  ;;  %v488_v27 = vld [vmem:[%s856_s0 + $0xc8] sm:$0xff] }
   0x8   :  { %v563_v28 = vld [vmem:[%s857_s1] sm:$0xff]  }
   0x9   :  { %518 = vmatpush3.bf16.msra.mxu0 %v42_v8 }
   0xa   :  { %538 = vmatpush3.bf16.msra.mxu1 %v165_v12  ;;  %519 = vmatprep.subr.bf16.mxu0 %v43_v16 }
   0xb   :  { %539 = vmatprep.subr.bf16.mxu1 %v166_v17 }
   0xd   :  { %520 = vmatpush3.bf16.msra.mxu0 %v43_v16 }
   0xe   :  { %8 = vsyncpa [#allocation3], 0  ;;  %540 = vmatpush3.bf16.msra.mxu1 %v166_v17  ;;  %521 = vmatprep.subr.bf16.mxu0 %v44_v22  ;;  %v45_v29 = vpack.c.bf16 %v34_v24, %v33_v23  ;;  %v168_v30 = vpack.c.bf16 %v488_v27, %v487_v26  ;;  %v35_v31 = vld [vmem:[%s856_s0 + $0x50] sm:$0xff]  ;;  %v36_v32 = vld [vmem:[%s856_s0 + $0x58] sm:$0xff]  ;;  %vm110_vm0 = vcmask 523264   ;;  %v599_v18 = vmov 16  }
   0xf   :  { %541 = vmatprep.subr.bf16.mxu1 %v167_v25  ;;  %531 = vmatprep.mubr.bf16.mxu0 %v563_v28  ;;  %v489_v33 = vld [vmem:[%s856_s0 + $0xd0] sm:$0xff]  ;;  %v490_v34 = vld [vmem:[%s856_s0 + $0xd8] sm:$0xff]  ;;  %v46_v35 = vpack.c.bf16 %v36_v32, %v35_v31  ;;  %v37_v37 = vld [vmem:[%s856_s0 + $0x60] sm:$0xff]  ;;  %s600_s26 = smov 1   ;;  %vm385_vm1 = vcmask 130048   ;;  %s602_s8 = smov [#allocation2]  }
  0x10   :  { %551 = vmatprep.mubr.bf16.mxu1 %v563_v28  ;;  %v169_v36 = vpack.c.bf16 %v490_v34, %v489_v33  ;;  %v38_v38 = vld [vmem:[%s856_s0 + $0x68] sm:$0xff]  ;;  %v491_v39 = vld [vmem:[%s856_s0 + $0xe0] sm:$0xff]  ;;  %v39_v43 = vld [vmem:[%s856_s0 + $0x70] sm:$0xff]  ;;  %559 = vset.pattern.permute.xlu0 %v599_v18  ;;  %s469_s9 = sshll.u32 %s602_s8, 4  ;;  %vm461_vm4 = vcmask 123904   ;;  %s470_s9 = int_to_ptr.vmem [resolvable:$true] %s469_s9 }
  0x11   :  { %522 = vmatpush3.bf16.msra.mxu0 %v44_v22  ;;  %v492_v40 = vld [vmem:[%s856_s0 + $0xe8] sm:$0xff]  ;;  %v47_v41 = vpack.c.bf16 %v38_v38, %v37_v37  ;;  %v40_v44 = vld [vmem:[%s856_s0 + $0x78] sm:$0xff]  ;;  %v493_v45 = vld [vmem:[%s856_s0 + $0xf0] sm:$0xff]  ;;  %560 = vset.pattern.permute.xlu1 %v599_v18  ;;  %s575_s10 = scalar_lea.vmem %s470_s9, 32  ;;  %p580_p1 = scmp.lt.s32.totalorder %s470_s9, %s470_s9 }
  0x12   :  { %542 = vmatpush3.bf16.msra.mxu1 %v167_v25  ;;  %523 = vmatprep.subr.bf16.mxu0 %v45_v29  ;;  %v170_v42 = vpack.c.bf16 %v492_v40, %v491_v39  ;;  %v494_v46 = vld [vmem:[%s856_s0 + $0xf8] sm:$0xff]  ;;  %v48_v47 = vpack.c.bf16 %v40_v44, %v39_v43  ;;  %v564_v49 = vld [vmem:[%s857_s1 + $0x8] sm:$0xff]   ;;  %p576_p0 = scmp.ne.s32.totalorder %s470_s9, %s575_s10  ;;  %p581_p2 = scmp.lt.s32.totalorder %s575_s10, %s575_s10 }
  0x13   :  { %543 = vmatprep.subr.bf16.mxu1 %v168_v30  ;;  %v171_v48 = vpack.c.bf16 %v494_v46, %v493_v45  ;;  %v796_v18 = vld [vmem:[%s858_s2 + $0x8] sm:$0xff] }
  0x14   :  { %p582_p3 = por %p581_p2, %p580_p1 }
  0x15   :  { %524 = vmatpush3.bf16.msra.mxu0 %v45_v29 }
  0x16   :  { %544 = vmatpush3.bf16.msra.mxu1 %v168_v30  ;;  %525 = vmatprep.subr.bf16.mxu0 %v46_v35  ;;  %p583_p4 = pnand %p582_p3, %p576_p0 }
  0x17   :  { %545 = vmatprep.subr.bf16.mxu1 %v169_v36 }
  0x19   :  { %526 = vmatpush3.bf16.msra.mxu0 %v46_v35 }
  0x1a   :  { %546 = vmatpush3.bf16.msra.mxu1 %v169_v36  ;;  %527 = vmatprep.subr.bf16.mxu0 %v47_v41 }
  0x1b   :  { %547 = vmatprep.subr.bf16.mxu1 %v170_v42 }
  0x1d   :  { %528 = vmatpush3.bf16.msra.mxu0 %v47_v41 }
  0x1e   :  { %548 = vmatpush3.bf16.msra.mxu1 %v170_v42  ;;  %529 = vmatprep.subr.bf16.mxu0 %v48_v47 }
  0x1f   :  { %549 = vmatprep.subr.bf16.mxu1 %v171_v48 }
  0x21   :  { %530 = vmatpush3.bf16.msra.mxu0 %v48_v47 }
  0x22   :  { %550 = vmatpush3.bf16.msra.mxu1 %v171_v48 }
  0x24   :  { %532 = vmatmul.mubr.bf16.vlgmr.msra.gmra.mrb[0].mxu0 %v564_v49 }
  0x25   :  { %552 = vmatmul.mubr.bf16.vlgmr.msra.gmra.mrb[0].mxu1 %v564_v49 }
  0xf7   :  { %v725_v50 = vpop.f32.mrb[0].mxu0 }
  0xf8   :  { %v727_v51 = vpop.f32.mrb[0].mxu1  ;;  %v729_v52 = vpop.f32.mrb[1].mxu0  ;;  %v117_v53 = vsel %vm110_vm0, %v725_v50, 0.0  ;;  %v129_v62 = vmul.f32 %v725_v50, %v725_v50 }
  0xf9   :  { %v733_v54 = vpop.f32.mrb[1].mxu1  ;;  %v227_v55 = vsel %vm110_vm0, %v727_v51, 0.0  ;;  %118 = vadd.xlane.f32.xlu0 %v117_v53  ;;  %v737_v56 = vpop.f32.mrb[2].mxu0  ;;  %v111_v60 = vsel %vm110_vm0, %v729_v52, 0.0  ;;  %v239_v1 = vmul.f32 %v727_v51, %v727_v51  ;;  %v127_v7 = vmul.f32 %v729_v52, %v729_v52 }
  0xfa   :  { %228 = vadd.xlane.f32.xlu1 %v227_v55  ;;  %v739_v57 = vpop.f32.mrb[2].mxu1  ;;  %v741_v58 = vpop.f32.mrb[3].mxu0  ;;  %v221_v61 = vsel %vm110_vm0, %v733_v54, 0.0  ;;  %v120_v63 = vsel %vm110_vm0, %v737_v56, 0.0  ;;  %v137_v0 = vsel %vm110_vm0, %v129_v62, 0.0  ;;  %v237_v5 = vmul.f32 %v733_v54, %v733_v54 }
  0xfb   :  { %v743_v59 = vpop.f32.mrb[3].mxu1  ;;  %v230_v2 = vsel %vm110_vm0, %v739_v57, 0.0  ;;  %v247_v3 = vsel %vm110_vm0, %v239_v1, 0.0  ;;  %v114_v4 = vsel %vm110_vm0, %v741_v58, 0.0  ;;  %v128_v8 = vmul.f32 %v741_v58, %v741_v58 }
  0xfc   :  { %v224_v6 = vsel %vm110_vm0, %v743_v59, 0.0  ;;  %v241_v9 = vsel %vm110_vm0, %v237_v5, 0.0  ;;  %v238_v10 = vmul.f32 %v743_v59, %v743_v59  ;;  %v131_v11 = vsel %vm110_vm0, %v127_v7, 0.0  ;;  %v784_v7 = vld [vmem:[%s858_s2 + $0x10] sm:$0xff] }
  0xfd   :  { %112 = vadd.xlane.f32.xlu0 %v111_v60  ;;  %v134_v12 = vsel %vm110_vm0, %v128_v8, 0.0  ;;  %v130_v13 = vmul.f32 %v737_v56, %v737_v56  ;;  %v240_v15 = vmul.f32 %v739_v57, %v739_v57 }
  0xfe   :  { %222 = vadd.xlane.f32.xlu1 %v221_v61  ;;  %v244_v14 = vsel %vm110_vm0, %v238_v10, 0.0 }
  0xff   :  { %v140_v16 = vsel %vm110_vm0, %v130_v13, 0.0  ;;  %v250_v17 = vsel %vm110_vm0, %v240_v15, 0.0  ;;  %v790_v15 = vld [vmem:[%s858_s2] sm:$0xff] }
 0x101   :  { %121 = vadd.xlane.f32.xlu0 %v120_v63 }
 0x102   :  { %138 = vadd.xlane.f32.xlu1 %v137_v0 }
 0x105   :  { %231 = vadd.xlane.f32.xlu0 %v230_v2 }
 0x106   :  { %248 = vadd.xlane.f32.xlu1 %v247_v3 }
 0x109   :  { %115 = vadd.xlane.f32.xlu0 %v114_v4 }
 0x10a   :  { %225 = vadd.xlane.f32.xlu1 %v224_v6 }
 0x10d   :  { %242 = vadd.xlane.f32.xlu0 %v241_v9 }
 0x10e   :  { %132 = vadd.xlane.f32.xlu1 %v131_v11 }
 0x111   :  { %135 = vadd.xlane.f32.xlu0 %v134_v12 }
 0x112   :  { %245 = vadd.xlane.f32.xlu1 %v244_v14 }
 0x115   :  { %141 = vadd.xlane.f32.xlu0 %v140_v16 }
 0x116   :  { %251 = vadd.xlane.f32.xlu1 %v250_v17 }
 0x186   :  { %v119_v19 = vpop.xlane.xlu0 %118 }
 0x187   :  { %v229_v20 = vpop.xlane.xlu1 %228 }
 0x188   :  { %v235_v23 = vadd.f32 %v229_v20, %v119_v19 }
 0x18a   :  { %v113_v21 = vpop.xlane.xlu0 %112  ;;  %v259_v26 = vmul.f32 0.0078125, %v235_v23 }
 0x18b   :  { %v223_v22 = vpop.xlane.xlu1 %222 }
 0x18c   :  { %v233_v30 = vadd.f32 %v223_v22, %v113_v21  ;;  %v267_v31 = vmul.f32 %v259_v26, %v259_v26  ;;  %v802_v22 = vld [vmem:[%s858_s2 + $0x18] sm:$0xff] }
 0x18e   :  { %v122_v24 = vpop.xlane.xlu0 %121  ;;  %v257_v36 = vmul.f32 0.0078125, %v233_v30 }
 0x18f   :  { %v139_v25 = vpop.xlane.xlu1 %138 }
 0x190   :  { %v265_v43 = vmul.f32 %v257_v36, %v257_v36 }
 0x192   :  { %v232_v27 = vpop.xlane.xlu0 %231 }
 0x193   :  { %v249_v28 = vpop.xlane.xlu1 %248  ;;  %v236_v44 = vadd.f32 %v232_v27, %v122_v24  ;;  %v601_v27 = vmov 17  }
 0x194   :  { %v255_v29 = vadd.f32 %v249_v28, %v139_v25 }
 0x195   :  { %v260_v55 = vmul.f32 0.0078125, %v236_v44 }
 0x196   :  { %v263_v32 = vmul.f32 0.0078125, %v255_v29  ;;  %v116_v33 = vpop.xlane.xlu0 %115 }
 0x197   :  { %v226_v34 = vpop.xlane.xlu1 %225  ;;  %v268_v4 = vmul.f32 %v260_v55, %v260_v55 }
 0x198   :  { %v271_v35 = vsub.f32 %v263_v32, %v267_v31  ;;  %v234_v38 = vadd.f32 %v226_v34, %v116_v33 }
 0x19a   :  { %v275_v37 = vmax.f32 %v271_v35, 0.0  ;;  %v243_v39 = vpop.xlane.xlu0 %242  ;;  %v258_v45 = vmul.f32 0.0078125, %v234_v38 }
 0x19b   :  { %v133_v40 = vpop.xlane.xlu1 %132 }
 0x19c   :  { %v279_v41 = vadd.f32 1e-05, %v275_v37  ;;  %v253_v42 = vadd.f32 %v243_v39, %v133_v40  ;;  %v266_v60 = vmul.f32 %v258_v45, %v258_v45 }
 0x19e   :  { %565 = vrsqrt.f32 %v279_v41  ;;  %v261_v46 = vmul.f32 0.0078125, %v253_v42  ;;  %v136_v47 = vpop.xlane.xlu0 %135 }
 0x19f   :  { %v246_v48 = vpop.xlane.xlu1 %245 }
 0x1a0   :  { %v269_v49 = vsub.f32 %v261_v46, %v265_v43  ;;  %v254_v53 = vadd.f32 %v246_v48, %v136_v47 }
 0x1a2   :  { %v273_v61 = vmax.f32 %v269_v49, 0.0  ;;  %v262_v62 = vmul.f32 0.0078125, %v254_v53  ;;  %v142_v63 = vpop.xlane.xlu0 %141 }
 0x1a3   :  { %v252_v0 = vpop.xlane.xlu1 %251 }
 0x1a4   :  { %v277_v1 = vadd.f32 1e-05, %v273_v61  ;;  %v270_v2 = vsub.f32 %v262_v62, %v266_v60  ;;  %v256_v3 = vadd.f32 %v252_v0, %v142_v63 }
 0x1a6   :  { %567 = vrsqrt.f32 %v277_v1  ;;  %v274_v5 = vmax.f32 %v270_v2, 0.0  ;;  %v264_v6 = vmul.f32 0.0078125, %v256_v3 }
 0x1a8   :  { %v566_v8 = vpop.eup %565  ;;  %v278_v9 = vadd.f32 1e-05, %v274_v5  ;;  %v272_v10 = vsub.f32 %v264_v6, %v268_v4 }
 0x1a9   :  { %v287_v11 = vmul.f32 %v566_v8, %v784_v7 }
 0x1aa   :  { %569 = vrsqrt.f32 %v278_v9  ;;  %v276_v12 = vmax.f32 %v272_v10, 0.0 }
 0x1ab   :  { %v291_v13 = vmul.f32 %v287_v11, %v259_v26 }
 0x1ac   :  { %v280_v14 = vadd.f32 1e-05, %v276_v12 }
 0x1ad   :  { %301 = vrot.lane.b32.xlu1 %v291_v13, %s600_s26 }
 0x1ae   :  { %571 = vrsqrt.f32 %v280_v14 }
 0x1b0   :  { %v568_v16 = vpop.eup %567 }
 0x1b1   :  { %v285_v17 = vmul.f32 %v568_v16, %v790_v15 }
 0x1b3   :  { %v289_v19 = vmul.f32 %v285_v17, %v257_v36 }
 0x1b4   :  { %v570_v20 = vpop.eup %569 }
 0x1b5   :  { %297 = vrot.lane.b32.xlu0 %v289_v19, %s600_s26  ;;  %v286_v21 = vmul.f32 %v570_v20, %v796_v18 }
 0x1b7   :  { %v290_v23 = vmul.f32 %v286_v21, %v258_v45 }
 0x1b8   :  { %v572_v24 = vpop.eup %571 }
 0x1b9   :  { %315 = vperm.xlu0 %559, %v285_v17   ;;  %299 = vrot.lane.b32.xlu1 %v290_v23, %s600_s26  ;;  %v288_v25 = vmul.f32 %v572_v24, %v802_v22 }
 0x1bb   :  { %v292_v26 = vmul.f32 %v288_v25, %v260_v55 }
 0x1bd   :  { %303 = vrot.lane.b32.xlu1 %v292_v26, %s600_s26  ;;  %561 = vset.pattern.permute.xlu0 %v601_v27 }
 0x1c1   :  { %320 = vperm.xlu1 %560, %v286_v21  }
 0x1c5   :  { %325 = vperm.xlu1 %560, %v287_v11  }
 0x1c9   :  { %330 = vperm.xlu1 %560, %v288_v25  }
 0x1cd   :  { %562 = vset.pattern.permute.xlu1 %v601_v27 }
 0x21f   :  { %v302_v28 = vpop.permute.xlu1 %301 }
 0x220   :  { %v311_v32 = vsub.f32 %v784_v7, %v302_v28 }
 0x227   :  { %v298_v29 = vpop.permute.xlu0 %297 }
 0x228   :  { %v309_v30 = vsub.f32 %v790_v15, %v298_v29 }
 0x22a   :  { %339 = vperm.xlu0 %561, %v309_v30  }
 0x22b   :  { %v300_v31 = vpop.permute.xlu1 %299 }
 0x22c   :  { %v310_v33 = vsub.f32 %v796_v18, %v300_v31 }
 0x22e   :  { %344 = vperm.xlu1 %562, %v310_v33   ;;  %349 = vperm.xlu0 %561, %v311_v32  }
 0x22f   :  { %v304_v34 = vpop.permute.xlu1 %303 }
 0x230   :  { %v312_v35 = vsub.f32 %v802_v22, %v304_v34 }
 0x232   :  { %354 = vperm.xlu1 %562, %v312_v35  }
 0x238   :  { %v316_v38 = vpop.permute.xlu0 %315 }
 0x239   :  { %v333_v41 = vmul.f32 %v316_v38, %v729_v52  ;;  %v400_v55 = vmul.f32 %v316_v38, %v733_v54 }
 0x240   :  { %v321_v36 = vpop.permute.xlu1 %320 }
 0x241   :  { %v334_v42 = vmul.f32 %v321_v36, %v741_v58  ;;  %v401_v2 = vmul.f32 %v321_v36, %v743_v59 }
 0x244   :  { %v326_v37 = vpop.permute.xlu1 %325 }
 0x245   :  { %v335_v43 = vmul.f32 %v725_v50, %v326_v37  ;;  %v402_v44 = vmul.f32 %v727_v51, %v326_v37 }
 0x248   :  { %v331_v39 = vpop.permute.xlu1 %330 }
 0x249   :  { %v403_v60 = vmul.f32 %v739_v57, %v331_v39  ;;  %v336_v6 = vmul.f32 %v737_v56, %v331_v39 }
 0x2a9   :  { %v340_v40 = vpop.permute.xlu0 %339 }
 0x2aa   :  { %v357_v45 = vadd.f32 %v340_v40, %v333_v41  ;;  %v404_v52 = vadd.f32 %v400_v55, %v340_v40 }
 0x2ac   :  { %v361_v63 = vmax.f32 %v357_v45, 0.0  ;;  %v408_v3 = vmax.f32 %v404_v52, 0.0 }
 0x2ad   :  { %v345_v46 = vpop.permute.xlu1 %344  ;;  %v350_v47 = vpop.permute.xlu0 %349 }
 0x2ae   :  { %v358_v48 = vadd.f32 %v345_v46, %v334_v42  ;;  %v359_v49 = vadd.f32 %v350_v47, %v335_v43  ;;  %v406_v53 = vadd.f32 %v402_v44, %v350_v47  ;;  %v405_v4 = vadd.f32 %v401_v2, %v345_v46  ;;  %v24_v2 = vld [vmem:[%s858_s2 + $0x20] sm:$0x1] }
 0x2af   :  { %v365_v57 = vsel %vm110_vm0, %v361_v63, 0.0  ;;  %v412_v10 = vsel %vm110_vm0, %v408_v3, 0.0 }
 0x2b0   :  { %v362_v61 = vmax.f32 %v358_v48, 0.0  ;;  %v363_v62 = vmax.f32 %v359_v49, 0.0  ;;  %v410_v58 = vmax.f32 %v406_v53, 0.0  ;;  %v409_v8 = vmax.f32 %v405_v4, 0.0 }
 0x2b1   :  { %v355_v0 = vpop.permute.xlu1 %354 }
 0x2b2   :  { %v407_v1 = vadd.f32 %v403_v60, %v355_v0  ;;  %v368_v50 = vsel %vm110_vm0, %v362_v61, 0.0  ;;  %v371_v51 = vsel %vm110_vm0, %v363_v62, 0.0  ;;  %v418_v5 = vsel %vm110_vm0, %v410_v58, 0.0 }
 0x2b3   :  { %369 = vadd.xlane.f32.xlu1 %v368_v50  ;;  %372 = vadd.xlane.f32.xlu0 %v371_v51  ;;  %v360_v9 = vadd.f32 %v355_v0, %v336_v6  ;;  %v415_v12 = vsel %vm110_vm0, %v409_v8, 0.0  ;;  %v446_v62 = vlaneseq }
 0x2b4   :  { %v411_v54 = vmax.f32 %v407_v1, 0.0 }
 0x2b5   :  { %v364_v59 = vmax.f32 %v360_v9, 0.0  ;;  %v447_v1 = vshrl.u32 %v446_v62, 7 }
 0x2b6   :  { %v421_v11 = vsel %vm110_vm0, %v411_v54, 0.0 }
 0x2b7   :  { %366 = vadd.xlane.f32.xlu0 %v365_v57  ;;  %419 = vadd.xlane.f32.xlu1 %v418_v5  ;;  %v374_v13 = vsel %vm110_vm0, %v364_v59, 0.0  ;;  %v451_v4 = vsub.s32 0, %v447_v1  ;;  %vm448_vm2 = vcmp.eq.s32.totalorder %v447_v1, 0  ;;  %vm454_vm3 = vcmp.eq.s32.totalorder %v447_v1, 1 }
 0x2bb   :  { %413 = vadd.xlane.f32.xlu0 %v412_v10  ;;  %422 = vadd.xlane.f32.xlu1 %v421_v11 }
 0x2bf   :  { %416 = vadd.xlane.f32.xlu0 %v415_v12 }
 0x2c3   :  { %375 = vadd.xlane.f32.xlu0 %v374_v13 }
 0x340   :  { %v370_v14 = vpop.xlane.xlu1 %369  ;;  %v373_v16 = vpop.xlane.xlu0 %372 }
 0x341   :  { %v378_v20 = vmul.f32 0.015625, %v370_v14  ;;  %v379_v27 = vmul.f32 0.015625, %v373_v16 }
 0x343   :  { %v382_v26 = vmul.f32 %v378_v20, %v796_v18  ;;  %v383_v35 = vmul.f32 %v379_v27, %v784_v7 }
 0x344   :  { %v367_v17 = vpop.xlane.xlu0 %366  ;;  %v420_v19 = vpop.xlane.xlu1 %419 }
 0x345   :  { %v377_v56 = vmul.f32 0.015625, %v367_v17  ;;  %v426_v28 = vmul.f32 0.015625, %v420_v19  ;;  %v387_v34 = vsel %vm385_vm1, %v382_v26, 0.0  ;;  %v389_v44 = vsel %vm385_vm1, %v383_v35, 0.0 }
 0x347   :  { %v381_v23 = vmul.f32 %v377_v56, %v790_v15  ;;  %v430_v36 = vmul.f32 %v426_v28, %v784_v7 }
 0x348   :  { %v414_v21 = vpop.xlane.xlu0 %413  ;;  %v423_v25 = vpop.xlane.xlu1 %422 }
 0x349   :  { %v424_v24 = vmul.f32 0.015625, %v414_v21  ;;  %v386_v30 = vsel %vm385_vm1, %v381_v23, 0.0  ;;  %v427_v32 = vmul.f32 0.015625, %v423_v25  ;;  %v435_v45 = vsel %vm385_vm1, %v430_v36, 0.0 }
 0x34a   :  { %v388_v38 = vadd.f32 %v387_v34, %v386_v30 }
 0x34b   :  { %v428_v31 = vmul.f32 %v424_v24, %v790_v15  ;;  %v431_v41 = vmul.f32 %v427_v32, %v802_v22 }
 0x34c   :  { %v417_v29 = vpop.xlane.xlu0 %416  ;;  %v390_v7 = vadd.f32 %v389_v44, %v388_v38 }
 0x34d   :  { %v425_v33 = vmul.f32 0.015625, %v417_v29  ;;  %v432_v40 = vsel %vm385_vm1, %v428_v31, 0.0 }
 0x34f   :  { %v429_v37 = vmul.f32 %v425_v33, %v796_v18  ;;  %v437_v18 = vsel %vm385_vm1, %v431_v41, 0.0 }
 0x350   :  { %v376_v39 = vpop.xlane.xlu0 %375 }
 0x351   :  { %v433_v42 = vsel %vm385_vm1, %v429_v37, 0.0  ;;  %v380_v43 = vmul.f32 0.015625, %v376_v39 }
 0x352   :  { %v434_v15 = vadd.f32 %v433_v42, %v432_v40 }
 0x353   :  { %v384_v46 = vmul.f32 %v380_v43, %v802_v22 }
 0x354   :  { %v436_v47 = vadd.f32 %v435_v45, %v434_v15 }
 0x355   :  { %v391_v48 = vsel %vm385_vm1, %v384_v46, 0.0 }
 0x356   :  { %v438_v49 = vadd.f32 %v437_v18, %v436_v47  ;;  %v392_v53 = vadd.f32 %v391_v48, %v390_v7 }
 0x358   :  { %v439_v55 = vrot.slane %v438_v49, 4  ;;  %v393_v60 = vrot.slane %v392_v53, 4 }
 0x35a   :  { %v440_v61 = vadd.f32 %v439_v55, %v438_v49  ;;  %v394_v63 = vadd.f32 %v393_v60, %v392_v53 }
 0x35c   :  { %v441_v52 = vrot.slane %v440_v61, 2  ;;  %v395_v0 = vrot.slane %v394_v63, 2 }
 0x35e   :  { %v442_v58 = vadd.f32 %v441_v52, %v440_v61  ;;  %v396_v50 = vadd.f32 %v395_v0, %v394_v63 }
 0x360   :  { %v443_v51 = vrot.slane %v442_v58, 1  ;;  %v397_v22 = vrot.slane %v396_v50, 1 }
 0x362   :  { %v444_v3 = vadd.f32 %v443_v51, %v442_v58  ;;  %v398_v54 = vadd.f32 %v397_v22, %v396_v50 }
 0x364   :  { %v399_v57 = vadd.f32 %v398_v54, %v24_v2  ;;  %v445_v5 = vadd.f32 %v444_v3, %v24_v2 }
 0x366   :  { %v452_v6 = vrot.slane %v399_v57, %v451_v4  ;;  %v458_v8 = vrot.slane %v445_v5, %v451_v4 }
 0x368   :  { %v453_v9 = vsel %vm448_vm2, %v452_v6, 0.0 }
 0x369   :  { %v459_v10 = vsel %vm454_vm3, %v458_v8, %v453_v9 }
 0x36a   :  { %573 = vtanh.f32 %v459_v10 }
 0x374   :  { %v574_v11 = vpop.eup %573 }
 0x375   :  { %462 = vst.msk [vmem:[#allocation2] sm:$0x3] %vm461_vm4, %v574_v11 }
 0x376   :  { %586 = shalt.err (!%p583_p4)
}
 0x377   :  { %s587_s12 = scalar_lea.hbm %s859_s3, 32 }
 0x378   :  { %p588_p5 = scmp.ne.s32.totalorder %s859_s3, %s587_s12  ;;  %p591_p6 = scmp.lt.u32.totalorder %s587_s12, %s859_s3 }
 0x37a   :  { %p593_p7 = pnand %p591_p6, %p588_p5 }
 0x37c   :  { %596 = shalt.err (!%p593_p7)
}
 0x37d   :  { %472 = dma.vmem_to_hbm [thread:$0]  %s470_s9, 32, %s859_s3, [#allocation3]  }
 0x37e   :  { %597 = dma.done.wait [#allocation3], 32  }
 0x37f   :  { %598 = vsyncadd [#allocation3], 4294967264 }
 0x380   :  { %476 = vsyncpa [#allocation3], 1 }

</bundles_post_ra>
